<compile_context>
chip_gen: v7x
topology: tpu7x:2x2x1
jax: 0.10.0
libtpu: 0.0.40
codegen_flags: <defaults>
</compile_context>

<pallas_src>
import functools
import math

import numpy as np
import jax
import jax.numpy as jnp
from jax.experimental import pallas as pl
from jax.experimental.pallas import tpu as pltpu

D_MODEL = 32        # Config.d_model (small synthetic value)
MAX_LEN = 1000
_MIN_TILES = 4      # target total grid tiles (pipelining + v7x 2-TC split)


def _build_pe(d_model: int, max_len: int) -> jnp.ndarray:
    """Deterministic positional-encoding buffer, shape (max_len, 1, d_model)."""
    position = np.arange(0, max_len, dtype=np.float32)[:, None]          # (L, 1)
    div_term = np.exp(np.arange(0, d_model, 2, dtype=np.float32)
                      * (-np.log(10000.0) / d_model))                    # (D/2,)
    pe = np.zeros((max_len, d_model), dtype=np.float32)
    pe[:, 0::2] = np.sin(position * div_term)
    pe[:, 1::2] = np.cos(position * div_term)
    return jnp.asarray(pe[:, None, :])                                   # (L, 1, D)


def _round_up(x: int, m: int) -> int:
    return ((x + m - 1) // m) * m


def _chip_budgets() -> tuple[int, int]:
    """(block_bytes, vmem_limit_bytes) tuned per TPU generation."""
    block_bytes, vmem_limit = 4 << 20, 64 << 20          # v5e / v6e (128 MiB VMEM)
    try:
        info = pltpu.get_tpu_info()
        vmem_cap = getattr(info, "vmem_capacity_bytes", None)
        if vmem_cap is not None and vmem_cap <= (80 << 20):
            # v7x-class: 64 MiB VMEM, ~3.2 TB/s HBM -> bigger blocks, tighter limit
            block_bytes, vmem_limit = 5 << 20, 40 << 20
    except Exception:
        pass
    return block_bytes, vmem_limit


def _tile_lanes(v, reps: int):
    """Repeat v (rows, w) `reps` times along the lane axis.

    O(log reps) lane-axis concatenations (core Mosaic op).  Piece order is
    irrelevant ONLY because every piece is itself a replica of v — keep that
    invariant if this helper is reused.
    """
    pieces, cur, r = [], v, reps
    while r:
        if r & 1:
            pieces.append(cur)
        r >>= 1
        if r:
            cur = jnp.concatenate([cur, cur], axis=-1)
    return pieces[0] if len(pieces) == 1 else jnp.concatenate(pieces, axis=-1)


def _pos_enc_kernel(x_ref, pe_ref, o_ref, *, scale, reps):
    # x_ref / o_ref: (tile_rows, tile_cols) lane-dense; pe_ref: (tile_rows, pw).
    # Row layout of x is [b0(d0..dD-1), b1(d0..dD-1), ...], so replicating the
    # pe block along lanes reproduces the (S, B, D) broadcast exactly.
    pe = pe_ref[...]
    if reps > 1:
        pe = _tile_lanes(pe, reps)
    o_ref[...] = x_ref[...] * scale + pe


def positional_encoding(x: jnp.ndarray, pe_full: jnp.ndarray) -> jnp.ndarray:
    """x: (S, B, D); returns x * sqrt(D) + pe[:S] (broadcast over B)."""
    S, B, D = x.shape
    scale = float(np.sqrt(D))
    itemsize = x.dtype.itemsize
    sub = {4: 8, 2: 16, 1: 32}.get(itemsize, 8)      # dtype-aware sublane quantum
    block_bytes, vmem_limit = _chip_budgets()

    total_cols = B * D
    x2 = x.reshape(S, total_cols)                    # lane-dense fold; free reshape

    # --- row tiling (sized against the full-width stripe) -------------------
    def rows_for(cols):
        r = max(sub, (block_bytes // max(1, cols * itemsize)) // sub * sub)
        return min(r, _round_up(S, sub))
    tile_rows = rows_for(total_cols)
    n_rows = int(pl.cdiv(S, tile_rows))              # ragged last block -> Pallas masks

    # --- optional column tiling ----------------------------------------------
    # tile_cols must be a multiple of lcm(D, 128) so the pe pattern is identical
    # in every column tile (and lanes stay 128-aligned).
    col_unit = math.lcm(D, 128)
    tile_cols, n_cols = total_cols, 1
    if total_cols % col_unit == 0 and total_cols // col_unit >= 2:
        units_total = total_cols // col_unit
        byte_cap = max(1, block_bytes // (col_unit * itemsize * sub))
        want = max(-(-units_total // byte_cap),              # keep blocks <= budget
                   -(-_MIN_TILES // max(n_rows, 1)))         # enough tiles overall
        if want > 1:
            n_cols = min(units_total, want)
            while units_total % n_cols:                      # uniform column blocks
                n_cols += 1
            tile_cols = (units_total // n_cols) * col_unit

    # --- pe base: pre-replicate to a full-vreg (128-lane) base when possible --
    pe_sd = pe_full[:S, 0, :].astype(x.dtype)                # (S, D)
    pw = 128 if (tile_cols % 128 == 0 and 128 % D == 0) else D
    pe_base = pe_sd if pw == D else jnp.tile(pe_sd, (1, pw // D))   # (S, pw)
    reps = tile_cols // pw

    kernel = functools.partial(_pos_enc_kernel, scale=scale, reps=reps)

    out = pl.pallas_call(
        kernel,
        out_shape=jax.ShapeDtypeStruct((S, total_cols), x.dtype),
        grid=(n_rows, n_cols),
        in_specs=[
            pl.BlockSpec((tile_rows, tile_cols), lambda i, j: (i, j)),  # x tile
            pl.BlockSpec((tile_rows, pw), lambda i, j: (i, 0)),         # pe: const across j
        ],
        out_specs=pl.BlockSpec((tile_rows, tile_cols), lambda i, j: (i, j)),
        compiler_params=pltpu.CompilerParams(
            dimension_semantics=("parallel", "parallel"),
            vmem_limit_bytes=vmem_limit,
        ),
    )(x2, pe_base)

    return out.reshape(S, B, D)


if __name__ == "__main__":
    key = jax.random.PRNGKey(0)
    S, B, D = 8, 2, D_MODEL
    x = jax.random.normal(key, (S, B, D), dtype=jnp.float32)

    pe_full = _build_pe(D_MODEL, MAX_LEN)

    out = jax.block_until_ready(positional_encoding(x, pe_full))

    # Reference check (pure JAX)
    ref = x * jnp.sqrt(jnp.float32(D)) + pe_full[:S]
    np.testing.assert_allclose(np.asarray(out), np.asarray(ref),
                               rtol=1e-6, atol=1e-6)
    print("KERNEL_OK")
</pallas_src>

<mosaic_0001>
module attributes {stable_mosaic.version = 11 : i64} {
  func.func @_pos_enc_kernel(%arg0: i32, %arg1: i32, %arg2: memref<8x64xf32, #tpu.memory_space<vmem>>, %arg3: memref<8x32xf32, #tpu.memory_space<vmem>>, %arg4: memref<8x64xf32, #tpu.memory_space<vmem>>) attributes {dimension_semantics = [#tpu.dimension_semantics<parallel>, #tpu.dimension_semantics<parallel>], iteration_bounds = array<i64: 1, 1>, scalar_prefetch = 0 : i64, scratch_operands = 0 : i64, tpu.core_type = #tpu.core_type<tc>, window_params = [{transform_indices = @transform_0, window_bounds = array<i64: 8, 64>}, {transform_indices = @transform_1, window_bounds = array<i64: 8, 32>}, {transform_indices = @transform_2, window_bounds = array<i64: 8, 64>}]} {
    %c0 = arith.constant 0 : index
    %c0_0 = arith.constant 0 : index
    %0 = vector.load %arg3[%c0, %c0_0] : memref<8x32xf32, #tpu.memory_space<vmem>>, vector<8x32xf32>
    %1 = tpu.concatenate %0, %0 in 1 : vector<8x32xf32>, vector<8x32xf32> -> vector<8x64xf32>
    %c0_1 = arith.constant 0 : index
    %c0_2 = arith.constant 0 : index
    %2 = vector.load %arg2[%c0_1, %c0_2] : memref<8x64xf32, #tpu.memory_space<vmem>>, vector<8x64xf32>
    %cst = arith.constant 5.65685415 : f32
    %3 = vector.broadcast %cst : f32 to vector<8x64xf32>
    %4 = arith.mulf %2, %3 : vector<8x64xf32>
    %5 = arith.addf %4, %1 : vector<8x64xf32>
    %c0_3 = arith.constant 0 : index
    %c0_4 = arith.constant 0 : index
    %6 = vector.load %arg4[%c0_3, %c0_4] : memref<8x64xf32, #tpu.memory_space<vmem>>, vector<8x64xf32>
    tpu.vector_store %arg4[%c0_3, %c0_4], %5 {strides = array<i32>} : memref<8x64xf32, #tpu.memory_space<vmem>>, vector<8x64xf32>,
    return
  }
  func.func @transform_0(%arg0: i32, %arg1: i32) -> (i32, i32) {
    %c0_i32 = arith.constant 0 : i32
    return %arg0, %arg1 : i32, i32
  }
  func.func @transform_1(%arg0: i32, %arg1: i32) -> (i32, i32) {
    %c0_i32 = arith.constant 0 : i32
    %c0_i32_0 = arith.constant 0 : i32
    return %arg0, %c0_i32 : i32, i32
  }
  func.func @transform_2(%arg0: i32, %arg1: i32) -> (i32, i32) {
    %c0_i32 = arith.constant 0 : i32
    return %arg0, %arg1 : i32, i32
  }
}

</mosaic_0001>

<bundles_post_ra>
// kernel: tpu_custom_call.1
= control target key start
LH: loop header
LB: loop body
LE: loop exit
PB: predicated region body
PF: predicated region fallthrough
CT: control target
= control target key end

     0   :  { %7 = vsyncpa [#allocation3], 0  ;;  %s195_s0 = inlined_call_operand.hbm [shape: f32[8,64], index: 0, kind: input, shape index: {}]   ;;  %s196_s1 = inlined_call_operand.hbm [shape: f32[8,32], index: 1, kind: input, shape index: {}]   ;;  %s197_s2 = inlined_call_operand.hbm [shape: f32[8,64], index: 2, kind: output, shape index: {}]  }
   0x1   :  { %8 = vsyncpa [#allocation6], 0 }
   0x2   :  { %9 = vsyncpa [#allocation4], 0  ;;  %s140_s9 = smov [#allocation2]   ;;  %s141_s11 = smov [#allocation5]  }
   0x3   :  { %s16_s10 = sshll.u32 %s140_s9, 4  ;;  %s26_s12 = sshll.u32 %s141_s11, 4  ;;  %s17_s10 = int_to_ptr.vmem [resolvable:$true] %s16_s10  ;;  %s27_s12 = int_to_ptr.vmem [resolvable:$true] %s26_s12 }
   0x4   :  { %s68_s15 = scalar_lea.hbm %s195_s0, 128 }
   0x5   :  { %p69_p0 = scmp.ne.s32.totalorder %s195_s0, %s68_s15  ;;  %p72_p1 = scmp.lt.u32.totalorder %s68_s15, %s195_s0 }
   0x7   :  { %p74_p2 = pnand %p72_p1, %p69_p0 }
   0x9   :  { %77 = shalt.err (!%p74_p2)
}
   0xa   :  { %s78_s20 = scalar_lea.vmem %s17_s10, 128  ;;  %p83_p4 = scmp.lt.s32.totalorder %s17_s10, %s17_s10 }
   0xb   :  { %p79_p3 = scmp.ne.s32.totalorder %s17_s10, %s78_s20  ;;  %p84_p5 = scmp.lt.s32.totalorder %s78_s20, %s78_s20 }
   0xd   :  { %p85_p6 = por %p84_p5, %p83_p4 }
   0xf   :  { %p86_p7 = pnand %p85_p6, %p79_p3 }
  0x11   :  { %89 = shalt.err (!%p86_p7)
}
  0x12   :  { %19 = dma.hbm_to_vmem [thread:$0]  %s195_s0, 128, %s17_s10, [#allocation3]  }
  0x13   :  { %s90_s25 = scalar_lea.hbm %s196_s1, 128 }
  0x14   :  { %p91_p8 = scmp.ne.s32.totalorder %s196_s1, %s90_s25  ;;  %p94_p9 = scmp.lt.u32.totalorder %s90_s25, %s196_s1 }
  0x16   :  { %p96_p10 = pnand %p94_p9, %p91_p8 }
  0x18   :  { %99 = shalt.err (!%p96_p10)
}
  0x19   :  { %s100_s30 = scalar_lea.vmem %s27_s12, 128  ;;  %p105_p12 = scmp.lt.s32.totalorder %s27_s12, %s27_s12 }
  0x1a   :  { %p101_p11 = scmp.ne.s32.totalorder %s27_s12, %s100_s30  ;;  %p106_p13 = scmp.lt.s32.totalorder %s100_s30, %s100_s30 }
  0x1c   :  { %p107_p0 = por %p106_p13, %p105_p12 }
  0x1e   :  { %p108_p1 = pnand %p107_p0, %p101_p11 }
  0x20   :  { %111 = shalt.err (!%p108_p1)
}
  0x21   :  { %29 = dma.hbm_to_vmem [thread:$0]  %s196_s1, 128, %s27_s12, [#allocation6]  }
  0x22   :  { %134 = dma.done.wait [#allocation3], 128  }
  0x23   :  { %135 = vsyncadd [#allocation3], 4294967168 }
  0x24   :  { %136 = dma.done.wait [#allocation6], 128  }
  0x25   :  { %137 = vsyncadd [#allocation6], 4294967168  ;;  %v36_v0 = vld [vmem:[#allocation5] sm:$0xff]  ;;  %s142_s4 = smov 32   ;;  %v43_v1 = vld [vmem:[#allocation2] sm:$0xff]  ;;  %vm41_vm0 = vcmask 261120  }
  0x26   :  { %38 = vrot.lane.b32.xlu0 %v36_v0, %s142_s4  ;;  %v44_v2 = vmul.f32 5.656854, %v43_v1  ;;  %s143_s5 = smov [#allocation7]   ;;  %vm46_vm1 = vcmask 523264  }
  0x27   :  { %s54_s6 = sshll.u32 %s143_s5, 4  ;;  %s55_s6 = int_to_ptr.vmem [resolvable:$true] %s54_s6 }
  0x28   :  { %s112_s7 = scalar_lea.vmem %s55_s6, 128  ;;  %p117_p3 = scmp.lt.s32.totalorder %s55_s6, %s55_s6 }
  0x29   :  { %p113_p2 = scmp.ne.s32.totalorder %s55_s6, %s112_s7  ;;  %p118_p4 = scmp.lt.s32.totalorder %s112_s7, %s112_s7 }
  0x2b   :  { %p119_p5 = por %p118_p4, %p117_p3 }
  0x2d   :  { %p120_p6 = pnand %p119_p5, %p113_p2 }
  0x98   :  { %v39_v3 = vpop.permute.xlu0 %38 }
  0x99   :  { %v42_v4 = vsel %vm41_vm0, %v36_v0, %v39_v3 }
  0x9a   :  { %v45_v5 = vadd.f32 %v44_v2, %v42_v4 }
  0x9c   :  { %47 = vst.msk [vmem:[#allocation7] sm:$0xff] %vm46_vm1, %v45_v5 }
  0x9d   :  { %123 = shalt.err (!%p120_p6)
}
  0x9e   :  { %s124_s9 = scalar_lea.hbm %s197_s2, 128 }
  0x9f   :  { %p125_p7 = scmp.ne.s32.totalorder %s197_s2, %s124_s9  ;;  %p128_p8 = scmp.lt.u32.totalorder %s124_s9, %s197_s2 }
  0xa1   :  { %p130_p9 = pnand %p128_p8, %p125_p7 }
  0xa3   :  { %133 = shalt.err (!%p130_p9)
}
  0xa4   :  { %57 = dma.vmem_to_hbm [thread:$0]  %s55_s6, 128, %s197_s2, [#allocation4]  }
  0xa5   :  { %138 = dma.done.wait [#allocation4], 128  }
  0xa6   :  { %139 = vsyncadd [#allocation4], 4294967168 }
  0xa7   :  { %61 = vsyncpa [#allocation3], 1 }
  0xa8   :  { %62 = vsyncpa [#allocation6], 1 }
  0xa9   :  { %63 = vsyncpa [#allocation4], 1 }

</bundles_post_ra>
